<compile_context>
chip_gen: v6e
topology: v6e:2x2x1
jax: 0.10.0
libtpu: 0.0.40
codegen_flags: <defaults>
</compile_context>

<pallas_src>
import functools

import jax
import jax.numpy as jnp
from jax.experimental import pallas as pl
from jax.experimental.pallas import tpu as pltpu

_F32_MAX = float(jnp.finfo(jnp.float32).max)


def _get_negative_mask(batchsize, neg=None):
    # only 'neg' negative samples are 1, others 0 (same as the torch helper)
    if neg is None or neg >= batchsize - 1:
        return jnp.ones((batchsize, batchsize), dtype=bool)
    identity = jnp.eye(batchsize, dtype=bool)
    mask = identity
    for st in range(1, neg + 1):
        mask = mask | jnp.roll(identity, shift=-st, axis=0)
    return mask


def _choose_tq(b, q, k, bytes_budget=12 << 20):
    """Pick a q-tile: full q when it fits (the proven path), otherwise the
    largest divisor of q that is a multiple of 32 (int8-mask friendly) whose
    per-program working set stays under the budget."""
    per_q = b * k * (4 * 4 + 1) + 6 * k * 4     # coarse per-q-row VMEM bound
    if q % 32 != 0 or per_q * q <= bytes_budget:
        return q
    best = None
    for d in range(32, q, 32):
        if q % d == 0 and per_q * d <= bytes_budget:
            best = d                            # largest fitting divisor
    if best is not None:
        return best
    for d in range(32, q, 32):                  # nothing fits: smallest tile
        if q % d == 0:
            return d
    return q


def _conloss_mask_kernel(row_ref, dup_ref, targ_ref, xmask_ref,
                         logit_ref, conf_ref, targ_out_ref, lossb_ref,
                         *, temperature, neg_num, b):
    neg_big = jnp.float32(_F32_MAX)             # torch.finfo(dtype).max
    inv_t = jnp.float32(1.0 / temperature)
    i = pl.program_id(0)

    # output[i, :, q-tile, :]: upcast on load, scale, apply duplicate_mask fill.
    x = row_ref[0].astype(jnp.float32) * inv_t                 # (b2, tq, k)
    x = jnp.where(dup_ref[0] != 0, -neg_big, x)                # dup -> -finf

    # b2 index per element (also used to extract the diagonal block below).
    b2 = jax.lax.broadcasted_iota(jnp.int32, x.shape, 0)       # (b2, tq, k)

    # Negative mask built in-kernel (no broadcast HBM tensor).  Fast path when
    # all negatives are kept (neg_num is None or >= b - 1): mask is all-ones.
    if neg_num is not None and neg_num < b - 1:
        d = b2 - i
        d = jnp.where(d < 0, d + b, d)
        xn = jnp.where(d <= neg_num, x, -neg_big)
    else:
        xn = x

    # log-softmax over the concatenated (b2, k) axes: sequential reductions.
    m = jnp.max(xn, axis=2, keepdims=True)                     # (b2, tq, 1)
    m = jnp.max(m, axis=0, keepdims=True)                      # (1, tq, 1)
    e = jnp.exp(xn - m)
    s = jnp.sum(e, axis=2, keepdims=True)
    s = jnp.sum(s, axis=0, keepdims=True)                      # (1, tq, 1)
    lse = jnp.log(s)

    # Diagonal block (b2 == i): one-hot select + sum over b2 of the resident
    # row (exact, no extra DMA, no dynamic slicing).  The negative mask never
    # touches the diagonal; the duplicate mask (already in x) may.
    xd = jnp.sum(jnp.where(b2 == i, x, jnp.float32(0.0)), axis=0)   # (tq, k)
    logit = xd - m[0] - lse[0]                                      # (tq, k)

    xm = xmask_ref[0] != 0                                     # (tq, k) bool
    targ = jnp.where(xm, targ_ref[0].astype(jnp.float32), jnp.float32(0.0))
    targ_out_ref[0] = targ

    # Per-(b, q-tile) loss numerator: -(pseudo_target * logit).sum()
    # (uses the logit *before* the x_mask fill, like the torch code).
    lossq = jnp.sum(-(targ * logit), axis=-1, keepdims=True)   # (tq, 1)
    lossb_ref[...] = jnp.sum(lossq, axis=0, keepdims=True)[None, None]  # (1,1,1,1)

    # conf = softmax(logit.masked_fill(~x_mask, -finf)); the returned 'logit'
    # aliases the x_mask-filled tensor (torch masked_fill_ semantics).
    cl = jnp.where(xm, logit, -neg_big)
    logit_ref[0] = cl
    cm = jnp.max(cl, axis=-1, keepdims=True)
    ce = jnp.exp(cl - cm)
    # Exact divide: the (tq, 1) reciprocal is negligible under the HBM-bound
    # roofline; pl.reciprocal(..., approx=True) would trade ~1e-3 accuracy in
    # 'score' for no measurable gain here.
    conf = ce / jnp.sum(ce, axis=-1, keepdims=True)
    conf_ref[0] = jnp.where(xm, conf, jnp.float32(0.0))


def conloss_mask_forward(output, duplicate_mask, batch_index, confidence,
                         x_mask=None, temperature=0.07, base_temperature=1.0,
                         neg_num=None):
    """Contrastive-path forward of ConLossMask (topk=None, attn_mask=None,
    no_contrastive=False)."""
    b, b2_, q, k = output.shape
    assert b == b2_, "output must be (b, b, q, k)"
    if x_mask is None:
        x_mask = jnp.ones((b, q, k), dtype=bool)

    # duplicate_mask arrives in the rearranged 'b1 q (b2 k)' layout (torch API);
    # view it as (b1, b2, q, k) int8 so the kernel keeps `output`'s natural
    # layout (only the tiny int8 mask is transposed, not the f32 tensor).
    dup4 = jnp.transpose(duplicate_mask.reshape(b, q, b, k).astype(jnp.int8),
                         (0, 2, 1, 3))
    xmask_i8 = x_mask.astype(jnp.int8)
    pseudo_target = confidence[batch_index]            # (b, q, k), XLA gather

    tq = _choose_tq(b, q, k)
    n_qt = q // tq

    kernel = functools.partial(_conloss_mask_kernel,
                               temperature=float(temperature),
                               neg_num=neg_num, b=b)

    out_shape = (
        jax.ShapeDtypeStruct((b, q, k), jnp.float32),     # logit (x_mask-filled)
        jax.ShapeDtypeStruct((b, q, k), jnp.float32),     # conf / score
        jax.ShapeDtypeStruct((b, q, k), jnp.float32),     # masked pseudo target
        jax.ShapeDtypeStruct((b, n_qt, 1, 1), jnp.float32),  # loss numerators
    )
    grid_spec = pltpu.PrefetchScalarGridSpec(
        num_scalar_prefetch=0,
        grid=(b, n_qt),
        in_specs=[
            pl.BlockSpec((1, b, tq, k), lambda i, j: (i, 0, j, 0)),   # output
            pl.BlockSpec((1, b, tq, k), lambda i, j: (i, 0, j, 0)),   # dup mask
            pl.BlockSpec((1, tq, k), lambda i, j: (i, j, 0)),         # target
            pl.BlockSpec((1, tq, k), lambda i, j: (i, j, 0)),         # x_mask
        ],
        out_specs=(
            pl.BlockSpec((1, tq, k), lambda i, j: (i, j, 0)),
            pl.BlockSpec((1, tq, k), lambda i, j: (i, j, 0)),
            pl.BlockSpec((1, tq, k), lambda i, j: (i, j, 0)),
            pl.BlockSpec((1, 1, 1, 1), lambda i, j: (i, j, 0, 0)),
        ),
    )
    logit, conf, targ, lossb = pl.pallas_call(
        kernel,
        out_shape=out_shape,
        grid_spec=grid_spec,
        compiler_params=pltpu.CompilerParams(
            # all grid points are independent -> megacore can shard freely
            dimension_semantics=("parallel", "parallel")),
    )(output, dup4, pseudo_target, xmask_i8)

    eps = jnp.finfo(jnp.float32).eps
    phrase_mask = x_mask[:, :, 0]
    loss = lossb.sum() / (phrase_mask.sum().astype(jnp.float32) + eps)
    loss = loss * base_temperature

    # atten = (output / T) rearranged to 'b1 q (b2 k)' with the duplicate fill,
    # exactly the tensor the torch forward returns.  One fused XLA pass.
    neg_fill = jnp.asarray(-jnp.finfo(output.dtype).max, output.dtype)
    atten = jnp.transpose(output, (0, 2, 1, 3)).reshape(b, q, b * k) / temperature
    atten = jnp.where(duplicate_mask, neg_fill, atten)

    # TODO(synk): topk / no_contrastive / attn_mask+origin_attn branches are not
    # implemented (defaults of the torch forward are reproduced); for extreme
    # b*k that overflows VMEM even at tq=32, tile b2 with an online-softmax
    # accumulator and raise vmem_limit_bytes.
    return loss, {"loss": loss, "atten": atten, "logit": logit, "target": targ,
                  "score": conf, "temperature": temperature}


def _ref_forward(output, duplicate_mask, batch_index, confidence, x_mask,
                 temperature, base_temperature, neg_num):
    """Pure-JAX reference mirroring the torch ConLossMask math."""
    b, _, q, k = output.shape
    neg_big = jnp.finfo(jnp.float32).max
    out_r = jnp.transpose(output.astype(jnp.float32), (0, 2, 1, 3))
    out_r = out_r.reshape(b, q, b * k) / temperature
    out_r = jnp.where(duplicate_mask, -neg_big, out_r)          # 'atten'
    neg_mask = _get_negative_mask(b, neg_num)
    neg_mask_r = jnp.broadcast_to(neg_mask[:, None, :, None],
                                  (b, q, b, k)).reshape(b, q, b * k)
    nm_out = jnp.where(neg_mask_r, out_r, -neg_big)
    maxv = nm_out.max(-1, keepdims=True)
    xs = nm_out - maxv
    lsm = xs - jnp.log(jnp.sum(jnp.exp(xs), axis=-1, keepdims=True))
    lsm4 = jnp.transpose(lsm.reshape(b, q, b, k), (0, 2, 1, 3))
    logit = lsm4[jnp.arange(b), jnp.arange(b)]
    pseudo = jnp.where(x_mask, confidence[batch_index].astype(jnp.float32), 0.0)
    phrase_mask = x_mask[:, :, 0]
    loss = -(pseudo * logit).sum(-1)
    loss = loss.sum() / (phrase_mask.sum() + jnp.finfo(jnp.float32).eps)
    loss = loss * base_temperature
    conf_logit = jnp.where(x_mask, logit, -neg_big)
    conf = jax.nn.softmax(conf_logit, axis=-1)
    conf = jnp.where(x_mask, conf, 0.0)
    return loss, out_r, conf_logit, conf, pseudo


if __name__ == "__main__":
    temperature = 0.07
    base_temperature = 1.0

    def run_case(b, q, k, n, neg_num):
        key = jax.random.PRNGKey(0)
        k1, k2, k3, k4 = jax.random.split(key, 4)
        confidence = jax.nn.softmax(
            jax.random.normal(k1, (n, q, k), jnp.float32), axis=-1)
        output = jax.random.normal(k2, (b, b, q, k), jnp.float32)
        batch_index = jax.random.permutation(k4, n)[:b].astype(jnp.int32)
        # x_mask: first few queries valid per sample, broadcast over k
        n_valid = jnp.array([max(1, q - 2 - (i % 3)) for i in range(b)])
        valid_q = jnp.arange(q)[None, :] < n_valid[:, None]
        x_mask = jnp.broadcast_to(valid_q[:, :, None], (b, q, k))
        # duplicate_mask in 'b1 q (b2 k)' layout; keep the diagonal block clean
        # so the loss stays finite (as in real usage).
        dup = jax.random.bernoulli(k3, 0.15, (b, q, b * k))
        col_b2 = (jnp.arange(b * k) // k)[None, None, :]
        diag_block = col_b2 == jnp.arange(b)[:, None, None]
        dup = jnp.logical_and(dup, jnp.logical_not(diag_block))

        loss, aux = conloss_mask_forward(
            output, dup, batch_index, confidence, x_mask=x_mask,
            temperature=temperature, base_temperature=base_temperature,
            neg_num=neg_num)
        jax.block_until_ready(loss)

        ref_loss, ref_atten, ref_logit, ref_conf, ref_targ = _ref_forward(
            output, dup, batch_index, confidence, x_mask,
            temperature, base_temperature, neg_num)

        assert bool(jnp.isfinite(loss))
        assert jnp.allclose(loss, ref_loss, rtol=1e-5, atol=1e-4)
        assert jnp.allclose(aux["logit"], ref_logit, rtol=1e-5, atol=1e-4)
        assert jnp.allclose(aux["score"], ref_conf, rtol=1e-4, atol=1e-4)
        assert jnp.allclose(aux["target"], ref_targ, rtol=1e-6, atol=1e-6)
        assert jnp.allclose(aux["atten"], ref_atten, rtol=1e-6, atol=1e-6)

    run_case(b=2, q=8, k=32, n=16, neg_num=None)   # fast path: all negatives kept
    run_case(b=4, q=8, k=32, n=16, neg_num=2)      # limited-negatives path
    print("KERNEL_OK")
</pallas_src>

<mosaic_0001>
module attributes {stable_mosaic.version = 11 : i64} {
  func.func @_conloss_mask_kernel(%arg0: i32, %arg1: i32, %arg2: memref<1x2x8x32xf32, #tpu.memory_space<vmem>>, %arg3: memref<1x2x8x32xi8, #tpu.memory_space<vmem>>, %arg4: memref<1x8x32xf32, #tpu.memory_space<vmem>>, %arg5: memref<1x8x32xi8, #tpu.memory_space<vmem>>, %arg6: memref<1x8x32xf32, #tpu.memory_space<vmem>>, %arg7: memref<1x8x32xf32, #tpu.memory_space<vmem>>, %arg8: memref<1x8x32xf32, #tpu.memory_space<vmem>>, %arg9: memref<1x1x1x1xf32, #tpu.memory_space<vmem>>) attributes {dimension_semantics = [#tpu.dimension_semantics<parallel>, #tpu.dimension_semantics<parallel>], iteration_bounds = array<i64: 2, 1>, scalar_prefetch = 0 : i64, scratch_operands = 0 : i64, tpu.core_type = #tpu.core_type<tc>, window_params = [{transform_indices = @transform_0, window_bounds = array<i64: 1, 2, 8, 32>}, {transform_indices = @transform_1, window_bounds = array<i64: 1, 2, 8, 32>}, {transform_indices = @transform_2, window_bounds = array<i64: 1, 8, 32>}, {transform_indices = @transform_3, window_bounds = array<i64: 1, 8, 32>}, {transform_indices = @transform_4, window_bounds = array<i64: 1, 8, 32>}, {transform_indices = @transform_5, window_bounds = array<i64: 1, 8, 32>}, {transform_indices = @transform_6, window_bounds = array<i64: 1, 8, 32>}, {transform_indices = @transform_7, window_bounds = array<i64: 1, 1, 1, 1>}]} {
    %c0 = arith.constant 0 : index
    %c0_0 = arith.constant 0 : index
    %c0_1 = arith.constant 0 : index
    %c0_2 = arith.constant 0 : index
    %0 = vector.load %arg2[%c0, %c0_0, %c0_1, %c0_2] : memref<1x2x8x32xf32, #tpu.memory_space<vmem>>, vector<1x2x8x32xf32>
    %1 = vector.shape_cast %0 : vector<1x2x8x32xf32> to vector<2x8x32xf32>
    %cst = arith.constant 14.2857141 : f32
    %2 = vector.broadcast %cst : f32 to vector<2x8x32xf32>
    %3 = arith.mulf %1, %2 : vector<2x8x32xf32>
    %c0_3 = arith.constant 0 : index
    %c0_4 = arith.constant 0 : index
    %c0_5 = arith.constant 0 : index
    %c0_6 = arith.constant 0 : index
    %4 = vector.load %arg3[%c0_3, %c0_4, %c0_5, %c0_6] : memref<1x2x8x32xi8, #tpu.memory_space<vmem>>, vector<1x2x8x32xi8>
    %5 = vector.shape_cast %4 : vector<1x2x8x32xi8> to vector<2x8x32xi8>
    %c0_i8 = arith.constant 0 : i8
    %6 = vector.broadcast %c0_i8 : i8 to vector<2x8x32xi8>
    %7 = arith.cmpi ne, %5, %6 : vector<2x8x32xi8>
    %cst_7 = arith.constant 0.000000e+00 : f32
    %cst_8 = arith.constant 3.40282347E+38 : f32
    %8 = arith.subf %cst_7, %cst_8 : f32
    %9 = vector.broadcast %8 : f32 to vector<2x8x32xf32>
    %10 = arith.select %7, %9, %3 : vector<2x8x32xi1>, vector<2x8x32xf32>
    %11 = tpu.iota {dimensions = array<i32: 0>} : vector<2x8x32xi32>
    %cst_9 = arith.constant dense<0xFF800000> : vector<2x8xf32>
    %12 = vector.multi_reduction <maximumf>, %10, %cst_9 [2] : vector<2x8x32xf32> to vector<2x8xf32>
    %13 = vector.shape_cast %12 : vector<2x8xf32> to vector<2x8x1xf32>
    %cst_10 = arith.constant dense<0xFF800000> : vector<8x1xf32>
    %14 = vector.multi_reduction <maximumf>, %13, %cst_10 [0] : vector<2x8x1xf32> to vector<8x1xf32>
    %15 = vector.shape_cast %14 : vector<8x1xf32> to vector<1x8x1xf32>
    %16 = vector.broadcast %15 : vector<1x8x1xf32> to vector<2x8x32xf32>
    %17 = arith.subf %10, %16 : vector<2x8x32xf32>
    %18 = math.exp %17 : vector<2x8x32xf32>
    %cst_11 = arith.constant dense<0.000000e+00> : vector<2x8xf32>
    %19 = vector.multi_reduction <add>, %18, %cst_11 [2] : vector<2x8x32xf32> to vector<2x8xf32>
    %20 = vector.shape_cast %19 : vector<2x8xf32> to vector<2x8x1xf32>
    %cst_12 = arith.constant dense<0.000000e+00> : vector<8x1xf32>
    %21 = vector.multi_reduction <add>, %20, %cst_12 [0] : vector<2x8x1xf32> to vector<8x1xf32>
    %22 = vector.shape_cast %21 : vector<8x1xf32> to vector<1x8x1xf32>
    %23 = math.log %22 : vector<1x8x1xf32>
    %24 = vector.broadcast %arg0 : i32 to vector<2x8x32xi32>
    %25 = arith.cmpi eq, %11, %24 : vector<2x8x32xi32>
    %cst_13 = arith.constant 0.000000e+00 : f32
    %26 = vector.broadcast %cst_13 : f32 to vector<2x8x32xf32>
    %27 = arith.select %25, %10, %26 : vector<2x8x32xi1>, vector<2x8x32xf32>
    %cst_14 = arith.constant dense<0.000000e+00> : vector<8x32xf32>
    %28 = vector.multi_reduction <add>, %27, %cst_14 [0] : vector<2x8x32xf32> to vector<8x32xf32>
    %29 = vector.shape_cast %15 : vector<1x8x1xf32> to vector<8x1xf32>
    %30 = vector.broadcast %29 : vector<8x1xf32> to vector<8x32xf32>
    %31 = arith.subf %28, %30 : vector<8x32xf32>
    %32 = vector.shape_cast %23 : vector<1x8x1xf32> to vector<8x1xf32>
    %33 = vector.broadcast %32 : vector<8x1xf32> to vector<8x32xf32>
    %34 = arith.subf %31, %33 : vector<8x32xf32>
    %c0_15 = arith.constant 0 : index
    %c0_16 = arith.constant 0 : index
    %c0_17 = arith.constant 0 : index
    %35 = vector.load %arg5[%c0_15, %c0_16, %c0_17] : memref<1x8x32xi8, #tpu.memory_space<vmem>>, vector<1x8x32xi8>
    %36 = vector.shape_cast %35 : vector<1x8x32xi8> to vector<8x32xi8>
    %c0_i8_18 = arith.constant 0 : i8
    %37 = vector.broadcast %c0_i8_18 : i8 to vector<8x32xi8>
    %38 = arith.cmpi ne, %36, %37 : vector<8x32xi8>
    %c0_19 = arith.constant 0 : index
    %c0_20 = arith.constant 0 : index
    %c0_21 = arith.constant 0 : index
    %39 = vector.load %arg4[%c0_19, %c0_20, %c0_21] : memref<1x8x32xf32, #tpu.memory_space<vmem>>, vector<1x8x32xf32>
    %40 = vector.shape_cast %39 : vector<1x8x32xf32> to vector<8x32xf32>
    %cst_22 = arith.constant 0.000000e+00 : f32
    %41 = vector.broadcast %cst_22 : f32 to vector<8x32xf32>
    %42 = arith.select %38, %40, %41 : vector<8x32xi1>, vector<8x32xf32>
    %c0_23 = arith.constant 0 : index
    %c0_24 = arith.constant 0 : index
    %c0_25 = arith.constant 0 : index
    %43 = vector.load %arg8[%c0_23, %c0_24, %c0_25] : memref<1x8x32xf32, #tpu.memory_space<vmem>>, vector<1x8x32xf32>
    %44 = vector.shape_cast %43 : vector<1x8x32xf32> to vector<8x32xf32>
    %45 = vector.shape_cast %42 : vector<8x32xf32> to vector<1x8x32xf32>
    tpu.vector_store %arg8[%c0_23, %c0_24, %c0_25], %45 {strides = array<i32>} : memref<1x8x32xf32, #tpu.memory_space<vmem>>, vector<1x8x32xf32>,
    %46 = arith.mulf %42, %34 : vector<8x32xf32>
    %cst_26 = arith.constant 0.000000e+00 : f32
    %47 = vector.broadcast %cst_26 : f32 to vector<8x32xf32>
    %48 = arith.subf %47, %46 : vector<8x32xf32>
    %cst_27 = arith.constant dense<0.000000e+00> : vector<8xf32>
    %49 = vector.multi_reduction <add>, %48, %cst_27 [1] : vector<8x32xf32> to vector<8xf32>
    %50 = vector.shape_cast %49 : vector<8xf32> to vector<8x1xf32>
    %cst_28 = arith.constant dense<0.000000e+00> : vector<1xf32>
    %51 = vector.multi_reduction <add>, %50, %cst_28 [0] : vector<8x1xf32> to vector<1xf32>
    %52 = vector.shape_cast %51 : vector<1xf32> to vector<1x1xf32>
    %53 = vector.shape_cast %52 : vector<1x1xf32> to vector<1x1x1x1xf32>
    %c0_29 = arith.constant 0 : index
    %c0_30 = arith.constant 0 : index
    %c0_31 = arith.constant 0 : index
    %c0_32 = arith.constant 0 : index
    %54 = vector.load %arg9[%c0_29, %c0_30, %c0_31, %c0_32] : memref<1x1x1x1xf32, #tpu.memory_space<vmem>>, vector<1x1x1x1xf32>
    tpu.vector_store %arg9[%c0_29, %c0_30, %c0_31, %c0_32], %53 {strides = array<i32>} : memref<1x1x1x1xf32, #tpu.memory_space<vmem>>, vector<1x1x1x1xf32>,
    %cst_33 = arith.constant 0.000000e+00 : f32
    %cst_34 = arith.constant 3.40282347E+38 : f32
    %55 = arith.subf %cst_33, %cst_34 : f32
    %56 = vector.broadcast %55 : f32 to vector<8x32xf32>
    %57 = arith.select %38, %34, %56 : vector<8x32xi1>, vector<8x32xf32>
    %c0_35 = arith.constant 0 : index
    %c0_36 = arith.constant 0 : index
    %c0_37 = arith.constant 0 : index
    %58 = vector.load %arg6[%c0_35, %c0_36, %c0_37] : memref<1x8x32xf32, #tpu.memory_space<vmem>>, vector<1x8x32xf32>
    %59 = vector.shape_cast %58 : vector<1x8x32xf32> to vector<8x32xf32>
    %60 = vector.shape_cast %57 : vector<8x32xf32> to vector<1x8x32xf32>
    tpu.vector_store %arg6[%c0_35, %c0_36, %c0_37], %60 {strides = array<i32>} : memref<1x8x32xf32, #tpu.memory_space<vmem>>, vector<1x8x32xf32>,
    %cst_38 = arith.constant dense<0xFF800000> : vector<8xf32>
    %61 = vector.multi_reduction <maximumf>, %57, %cst_38 [1] : vector<8x32xf32> to vector<8xf32>
    %62 = vector.shape_cast %61 : vector<8xf32> to vector<8x1xf32>
    %63 = vector.broadcast %62 : vector<8x1xf32> to vector<8x32xf32>
    %64 = arith.subf %57, %63 : vector<8x32xf32>
    %65 = math.exp %64 : vector<8x32xf32>
    %cst_39 = arith.constant dense<0.000000e+00> : vector<8xf32>
    %66 = vector.multi_reduction <add>, %65, %cst_39 [1] : vector<8x32xf32> to vector<8xf32>
    %67 = vector.shape_cast %66 : vector<8xf32> to vector<8x1xf32>
    %68 = vector.broadcast %67 : vector<8x1xf32> to vector<8x32xf32>
    %69 = arith.divf %65, %68 : vector<8x32xf32>
    %cst_40 = arith.constant 0.000000e+00 : f32
    %70 = vector.broadcast %cst_40 : f32 to vector<8x32xf32>
    %71 = arith.select %38, %69, %70 : vector<8x32xi1>, vector<8x32xf32>
    %c0_41 = arith.constant 0 : index
    %c0_42 = arith.constant 0 : index
    %c0_43 = arith.constant 0 : index
    %72 = vector.load %arg7[%c0_41, %c0_42, %c0_43] : memref<1x8x32xf32, #tpu.memory_space<vmem>>, vector<1x8x32xf32>
    %73 = vector.shape_cast %72 : vector<1x8x32xf32> to vector<8x32xf32>
    %74 = vector.shape_cast %71 : vector<8x32xf32> to vector<1x8x32xf32>
    tpu.vector_store %arg7[%c0_41, %c0_42, %c0_43], %74 {strides = array<i32>} : memref<1x8x32xf32, #tpu.memory_space<vmem>>, vector<1x8x32xf32>,
    return
  }
  func.func @transform_0(%arg0: i32, %arg1: i32) -> (i32, i32, i32, i32) {
    %c0_i32 = arith.constant 0 : i32
    %c0_i32_0 = arith.constant 0 : i32
    %c0_i32_1 = arith.constant 0 : i32
    return %arg0, %c0_i32, %arg1, %c0_i32_0 : i32, i32, i32, i32
  }
  func.func @transform_1(%arg0: i32, %arg1: i32) -> (i32, i32, i32, i32) {
    %c0_i32 = arith.constant 0 : i32
    %c0_i32_0 = arith.constant 0 : i32
    %c0_i32_1 = arith.constant 0 : i32
    return %arg0, %c0_i32, %arg1, %c0_i32_0 : i32, i32, i32, i32
  }
  func.func @transform_2(%arg0: i32, %arg1: i32) -> (i32, i32, i32) {
    %c0_i32 = arith.constant 0 : i32
    %c0_i32_0 = arith.constant 0 : i32
    return %arg0, %arg1, %c0_i32 : i32, i32, i32
  }
  func.func @transform_3(%arg0: i32, %arg1: i32) -> (i32, i32, i32) {
    %c0_i32 = arith.constant 0 : i32
    %c0_i32_0 = arith.constant 0 : i32
    return %arg0, %arg1, %c0_i32 : i32, i32, i32
  }
  func.func @transform_4(%arg0: i32, %arg1: i32) -> (i32, i32, i32) {
    %c0_i32 = arith.constant 0 : i32
    %c0_i32_0 = arith.constant 0 : i32
    return %arg0, %arg1, %c0_i32 : i32, i32, i32
  }
  func.func @transform_5(%arg0: i32, %arg1: i32) -> (i32, i32, i32) {
    %c0_i32 = arith.constant 0 : i32
    %c0_i32_0 = arith.constant 0 : i32
    return %arg0, %arg1, %c0_i32 : i32, i32, i32
  }
  func.func @transform_6(%arg0: i32, %arg1: i32) -> (i32, i32, i32) {
    %c0_i32 = arith.constant 0 : i32
    %c0_i32_0 = arith.constant 0 : i32
    return %arg0, %arg1, %c0_i32 : i32, i32, i32
  }
  func.func @transform_7(%arg0: i32, %arg1: i32) -> (i32, i32, i32, i32) {
    %c0_i32 = arith.constant 0 : i32
    %c0_i32_0 = arith.constant 0 : i32
    %c0_i32_1 = arith.constant 0 : i32
    return %arg0, %arg1, %c0_i32, %c0_i32_0 : i32, i32, i32, i32
  }
}

</mosaic_0001>

<bundles_post_ra>
// kernel: tpu_custom_call.1
= control target key start
LH: loop header
LB: loop body
LE: loop exit
PB: predicated region body
PF: predicated region fallthrough
CT: control target
= control target key end

     0   :  { %s1539_s0 = inlined_call_operand.hbm [shape: f32[2,2,8,32], index: 0, kind: input, shape index: {}]   ;;  %s1540_s1 = inlined_call_operand.hbm [shape: s8[2,2,8,32], index: 1, kind: input, shape index: {}]   ;;  %s1541_s2 = inlined_call_operand.hbm [shape: f32[2,8,32], index: 2, kind: input, shape index: {}]   ;;  %s1542_s3 = inlined_call_operand.vmem [shape: s8[2,8,32], index: 3, kind: input, shape index: {}]   ;;  %s1543_s4 = inlined_call_operand.hbm [shape: f32[2,8,32], index: 4, kind: output, shape index: {0}]   ;;  %s1544_s5 = inlined_call_operand.hbm [shape: f32[2,8,32], index: 5, kind: output, shape index: {1}]   ;;  %s1545_s6 = inlined_call_operand.hbm [shape: f32[2,8,32], index: 6, kind: output, shape index: {2}]   ;;  %s1546_s7 = inlined_call_operand.vmem [shape: f32[2,1,1,1], index: 7, kind: output, shape index: {3}]  }
   0x1   :  { %1555 = sst [smem:[#allocation22_spill]] %s1539_s0 }
   0x2   :  { %1556 = sst [smem:[#allocation23_spill]] %s1540_s1 }
   0x3   :  { %1557 = sst [smem:[#allocation24_spill]] %s1545_s6 }
   0x4   :  { %13 = vsyncpa [#allocation3], 0 }
   0x5   :  { %15 = vsyncpa [#allocation3 + $0x1], 0 }
   0x6   :  { %16 = vsyncpa [#allocation6], 0 }
   0x7   :  { %18 = vsyncpa [#allocation6 + $0x1], 0 }
   0x8   :  { %19 = vsyncpa [#allocation4], 0 }
   0x9   :  { %21 = vsyncpa [#allocation4 + $0x1], 0 }
   0xa   :  { %22 = vsyncpa [#allocation10], 0 }
   0xb   :  { %24 = vsyncpa [#allocation10 + $0x1], 0  ;;  %s1244_s24 = smov 0   ;;  %s1246_s25 = smov 0  }
   0xc   :  { %s1248_s26 = smov 0   ;;  %s1250_s27 = smov 0  }
   0xd   :  { %s1252_s28 = smov 0   ;;  %s1254_s29 = smov 0  }
   0xe LB: > { %1558 = sst [smem:[#allocation16_spill]] %s1171_s24  ;;  %s1275_s30 = sadd.s32 4294967295, %s1191_s29   ;;  %s1191_s29 = sphi %s1254_s29, %s30_s29   ;;  %s1187_s28 = sphi %s1252_s28, %s1586_s28   ;;  %s1183_s27 = sphi %s1250_s27, %s1585_s27   ;;  %s1179_s26 = sphi %s1248_s26, %s1581_s26   ;;  %s1175_s25 = sphi %s1246_s25, %s1584_s25   ;;  %s1171_s24 = sphi %s1244_s24, %s1583_s24  }
   0xf   : > { %1559 = sst [smem:[#allocation17_spill]] %s1179_s26  ;;  %s1547_s8 = sadd.s32 4294967294, %s1191_s29  }
  0x10   : > { %1560 = sst [smem:[#allocation18_spill]] %s1191_s29  ;;  %s42_s9 = sadd.s32 1, %s1187_s28 }
  0x11   : > { %s51_s10 = sadd.s32 1, %s1179_s26  ;;  %p44_p0 = scmp.ge.s32.totalorder %s42_s9, 2 }
  0x12   : > { %p58_p1 = scmp.ne.s32.totalorder %s1179_s26, %s1175_s25  ;;  %p59_p2 = scmp.eq.s32.totalorder %s1191_s29, 0 }
  0x13   : > { %p64_p3 = scmp.ne.s32.totalorder %s1175_s25, %s1171_s24  ;;  %s1588_s9 = smov (%p44_p0, %s42_s9), 0 }
  0x14   : > { %1561 = sst [smem:[#allocation19_spill]] %s1588_s9  ;;  %p1287_p4 = por %p59_p2, %p58_p1 }
  0x15   : > { %p65_p5 = scmp.eq.s32.totalorder %s1275_s30, 0  ;;  %s46_s12 = ssub.s32 %s1187_s28, %s1588_s9 }
  0x16   : > { %p174_p6 = scmp.eq.s32.totalorder %s1275_s30, 1  ;;  %p49_p7 = scmp.eq.s32.totalorder %s46_s12, 0 }
  0x17   : > { %p1295_p8 = por %p65_p5, %p64_p3  ;;  %p180_p10 = scmp.eq.s32.totalorder %s1547_s8, 1 }
  0x18   : > { %p1299_p9 = por %p174_p6, %p58_p1  ;;  %p902_p13 = scmp.lt.s32.totalorder %s1191_s29, 2 }
  0x19   : > { %s1306_s15 = scalar_select %p49_p7, %s1179_s26, %s51_s10  }
  0x1a   : > { %p1308_p11 = por %p180_p10, %p64_p3  ;;  %s1315_s17 = sand.u32 1, %s1179_s26  }
  0x1b   : > { %1565 = sst [smem:[#allocation20_spill]] %s1306_s15  ;;  %s306_s18 = sand.u32 1, %s1191_s29  }
  0x1c   : > { %s1566_s16 = scalar_select %p1308_p11, 1, 0 }
  0x1d   : > { %s847_s19 = sshll.u32 %s1315_s17, 2  ;;  %p1321_p0 = pnand %p902_p13, %p1287_p4 }
  0x1e   : > { %1567 = sst [smem:[#allocation21_spill]] %s1566_s16  ;;  %s869_s21 = sshll.u32 %s1187_s28, 6 }
  0x1f   : > { %s1569_s1 = sld [smem:[#allocation23_spill]]  ;;  %s310_s12 = scalar_lea.vmem [#allocation5], %s847_s19 }
  0x20   : > { %s318_s8 = sshll.u32 %s310_s12, 4  ;;  %s1329_s9 = scalar_lea.sflag [#allocation6], %s306_s18  ;;  %s319_s8 = int_to_ptr.vmem [resolvable:$true] %s318_s8 }
  0x21   : > { %p969_p1 = pneg %p1321_p0  ;;  %s980_s15 = scalar_lea.vmem %s319_s8, 64 }
  0x22   : > { %p981_p2 = scmp.ne.s32.totalorder %s319_s8, %s980_s15  ;;  %s1193_s11 = smov [#allocation5]  }
  0x23   : > { %s985_s26 = sshll.u32 %s1193_s11, 4  ;;  %s986_s26 = int_to_ptr.vmem [resolvable:$false] %s985_s26 }
  0x24   : > { %p983_p3 = pnand %p981_p2, %p969_p1  ;;  %s987_s16 = scalar_lea.vmem %s986_s26, 128 }
  0x25   : > { %s317_s10 = scalar_lea.hbm %s1569_s1, %s869_s21  ;;  %p988_p5 = scmp.lt.s32.totalorder %s319_s8, %s986_s26 }
  0x26   : > { %p984_p4 = pneg %p983_p3  ;;  %p989_p6 = scmp.lt.s32.totalorder %s987_s16, %s980_s15 }
  0x28   : > { %p990_p7 = por %p989_p6, %p988_p5 }
  0x2a   : > { %p991_p10 = pnand %p990_p7, %p984_p4 }
  0x2c   : > { %994 = shalt.err (!%p991_p10)
}
  0x2d   : > { %s1194_s19 = smov 32   ;;  %s1195_s18 = smov 2  }
  0x2e   : > { %888 = dma.hbm_to_vmem [thread:$0]  (!%p1321_p0), %s317_s10, 64, %s319_s8, %s1329_s9, %s1194_s19, %s1194_s19, %s1195_s18  }
  0x2f   : > { %p852_p13 = scmp.ge.s32.totalorder %s1191_s29, 1  ;;  %p355_p2 = scmp.lt.s32.totalorder %s1191_s29, 3 }
  0x30   : > { %s844_s15 = sshll.u32 %s1315_s17, 4  ;;  %s868_s16 = sshll.u32 %s1187_s28, 8 }
  0x31   : > { %p1341_p3 = pnand %p852_p13, %p355_p2  ;;  %s1571_s0 = sld [smem:[#allocation22_spill]] }
  0x32   : > { %s288_s12 = scalar_lea.vmem [#allocation2], %s844_s15  ;;  %s285_s1 = scalar_lea.sflag [#allocation3], %s1315_s17 }
  0x33   : > { %s296_s11 = sshll.u32 %s288_s12, 4  ;;  %s1196_s8 = smov [#allocation2]   ;;  %s297_s11 = int_to_ptr.vmem [resolvable:$true] %s296_s11 }
  0x34   : > { %s1008_s24 = scalar_lea.vmem %s297_s11, 256  ;;  %s1013_s10 = sshll.u32 %s1196_s8, 4  ;;  %s1014_s10 = int_to_ptr.vmem [resolvable:$false] %s1013_s10 }
  0x35   : > { %p1009_p4 = scmp.ne.s32.totalorder %s297_s11, %s1008_s24  ;;  %s1015_s19 = scalar_lea.vmem %s1014_s10, 512 }
  0x36   : > { %p1016_p7 = scmp.lt.s32.totalorder %s297_s11, %s1014_s10  ;;  %p1017_p10 = scmp.lt.s32.totalorder %s1015_s19, %s1008_s24 }
  0x37   : > { %s295_s23 = scalar_lea.hbm %s1571_s0, %s868_s16  ;;  %p1011_p5 = pnand %p1009_p4, %p969_p1 }
  0x38   : > { %p1018_p13 = por %p1017_p10, %p1016_p7 }
  0x39   : > { %p1012_p6 = pneg %p1011_p5 }
  0x3b   : > { %p1019_p2 = pnand %p1018_p13, %p1012_p6 }
  0x3d   : > { %1022 = shalt.err (!%p1019_p2)
}
  0x3e   : > { %s1197_s18 = smov 128   ;;  %s1198_s15 = smov 8  }
  0x3f   : > { %885 = dma.hbm_to_vmem [thread:$0]  (!%p1321_p0), %s295_s23, 256, %s297_s11, %s285_s1, %s1197_s18, %s1197_s18, %s1198_s15  }
  0x40   : > { %s850_s16 = sshll.u32 %s1315_s17, 3  ;;  %s851_s21 = sshll.u32 %s1187_s28, 7 }
  0x41   : > { %s338_s8 = scalar_lea.hbm %s1541_s2, %s851_s21  ;;  %s332_s0 = scalar_lea.vmem [#allocation7], %s850_s16 }
  0x42   : > { %s340_s10 = sshll.u32 %s332_s0, 4  ;;  %s1199_s19 = smov [#allocation7]   ;;  %s341_s10 = int_to_ptr.vmem [resolvable:$true] %s340_s10 }
  0x43   : > { %s1036_s24 = scalar_lea.vmem %s341_s10, 128  ;;  %s1041_s29 = sshll.u32 %s1199_s19, 4  ;;  %s1042_s29 = int_to_ptr.vmem [resolvable:$false] %s1041_s29 }
  0x44   : > { %p1037_p4 = scmp.ne.s32.totalorder %s341_s10, %s1036_s24  ;;  %s1043_s6 = scalar_lea.vmem %s1042_s29, 256 }
  0x45   : > { %p1044_p7 = scmp.lt.s32.totalorder %s341_s10, %s1042_s29  ;;  %p1045_p10 = scmp.lt.s32.totalorder %s1043_s6, %s1036_s24 }
  0x46   : > { %p1039_p5 = pnand %p1037_p4, %p969_p1 }
  0x47   : > { %p1046_p13 = por %p1045_p10, %p1044_p7 }
  0x48   : > { %p1040_p6 = pneg %p1039_p5 }
  0x4a   : > { %p1047_p2 = pnand %p1046_p13, %p1040_p6 }
  0x4c   : > { %1050 = shalt.err (!%p1047_p2)
}
  0x4d   : > { %891 = dma.hbm_to_vmem [thread:$0]  (!%p1321_p0), %s338_s8, 128, %s341_s10, %s1329_s9  }
  0x4e   : > { %359 = sbr.rel (%p1341_p3) target bundleno = 769 (0x301), region = 36  ;;  %s1370_s0 = sand.u32 (!%p1341_p3), 1, %s1175_s25  }
  0x4f   : > { %s853_s1 = sshll.u32 (!%p1341_p3), %s1370_s0, 4  ;;  %s362_s17 = scalar_lea.sflag (!%p1341_p3), [#allocation3], %s1370_s0 }
  0x50   : > { %s365_s29 = scalar_lea.vmem (!%p1341_p3), [#allocation2], %s853_s1 }
  0x53   : > { %1154 = dma.done.wait (%p1295_p8), %s362_s17, 256  }
  0x54   : > { %1156 = vsyncadd (%p1295_p8), %s362_s17, 4294967040  ;;  %s370_s6 = sand.u32 1, %s1275_s30   ;;  %s854_s9 = sshll.u32 %s1370_s0, 2 }
  0x55   : > { %s371_s20 = scalar_lea.sflag [#allocation6], %s370_s6  ;;  %s374_s26 = scalar_lea.vmem [#allocation5], %s854_s9 }
  0x56   : > { %1158 = dma.done.wait (%p1295_p8), %s371_s20, 192  }
  0x57   : > { %1160 = vsyncadd (%p1295_p8), %s371_s20, 4294967104  ;;  %v462_v0 = vld [vmem:[%s365_s29] sm:$0xff]  ;;  %v463_v2 = vld [vmem:[%s365_s29 + $0x8] sm:$0xff]  ;;  %v1200_v5 = vmov 0   ;;  %vm478_vm2 = vcmask 261120   ;;  %p447_p8 = scmp.lt.s32.totalorder %s1183_s27, 1  ;;  %v501_v34 = vstv %s1183_s27 }
  0x58   : > { %v466_v1 = vld [vmem:[%s374_s26] sm:$0x3]  ;;  %v467_v3 = vld [vmem:[%s374_s26 + $0x2] sm:$0x3]  ;;  %v464_v4 = vmul.f32 14.285714, %v462_v0 }
  0x59   : > { %vm468_vm0 = vnez %v466_v1  ;;  %vm469_vm1 = vnez %v467_v3  ;;  %v465_v8 = vmul.f32 14.285714, %v463_v2  ;;  %s1392_s13 = scalar_select %p447_p8, %s1183_s27, 1  ;;  %vm502_vm7 = vcmp.eq.s32.totalorder %v501_v34, 0 }
  0x5a   : > { %v470_v6 = vsel %vm468_vm0, 16843009, %v1200_v5  ;;  %v471_v9 = vsel %vm469_vm1, 16843009, %v1200_v5  ;;  %s1399_s16 = sshll.u32 %s1370_s0, 3  ;;  %vm503_vm8 = vcmp.eq.s32.totalorder %v501_v34, 1 }
  0x5b   : > { %v472_v7 = vunpack.c.0.s8 %v470_v6  ;;  %v473_v10 = vunpack.c.0.s8 %v471_v9  ;;  %s859_s23 = sshll.u32 %s1392_s13, 1  ;;  %s383_s21 = scalar_lea.vmem [#allocation7], %s1399_s16  ;;  %vm530_vm9 = vcmask 0  }
  0x5c   : > { %s453_s15 = scalar_lea.vmem %s1542_s3, %s859_s23  ;;  %v513_v30 = vld [vmem:[%s383_s21] sm:$0xff]  ;;  %s438_s22 = scalar_lea.vmem [#allocation11], %s1399_s16 }
  0x5d   : > { %vm474_vm3 = vcmp.ne.s32.totalorder %v472_v7, 0  ;;  %vm475_vm4 = vcmp.ne.s32.totalorder %v473_v10, 0  ;;  %v511_v26 = vld [vmem:[%s453_s15] sm:$0x3]  ;;  %s424_s12 = scalar_lea.vmem [#allocation8], %s1399_s16  ;;  %s459_s24 = scalar_lea.vmem %s1546_s7, %s1392_s13 }
  0x5e   : > { %v476_v11 = vsel %vm474_vm3, -3.4028235e+38, %v464_v4  ;;  %v477_v13 = vsel %vm475_vm4, -3.4028235e+38, %v465_v8  ;;  %vm512_vm5 = vnez %v511_v26  ;;  %s1427_s19 = sshll.u32 %s1183_s27, 7  ;;  %s578_s9 = sshll.u32 %s424_s12, 4  ;;  %s579_s9 = int_to_ptr.vmem [resolvable:$true] %s578_s9 }
  0x5f   : > { %v479_v12 = vsel %vm478_vm2, %v476_v11, -inf  ;;  %v482_v14 = vsel %vm478_vm2, %v477_v13, -inf  ;;  %v514_v27 = vsel %vm512_vm5, 16843009, %v1200_v5  ;;  %v504_v36 = vsel %vm502_vm7, %v476_v11, 0.0  ;;  %s576_s29 = scalar_lea.hbm %s1543_s4, %s1427_s19  ;;  %s548_s20 = scalar_lea.sflag [#allocation4], %s1370_s0 }
  0x60   : > { %480 = vmax.xlane.f32.xlu0 %v479_v12  ;;  %v515_v28 = vunpack.c.0.s8 %v514_v27  ;;  %v505_v37 = vsel %vm503_vm8, %v477_v13, 0.0  ;;  %v506_v38 = vsel %vm478_vm2, %v504_v36, 0.0  ;;  %s1051_s26 = scalar_lea.vmem %s579_s9, 128  ;;  %s1201_s13 = smov [#allocation8]  }
  0x61   : > { %v507_v39 = vsel %vm478_vm2, %v505_v37, 0.0  ;;  %p1052_p0 = scmp.ne.s32.totalorder %s579_s9, %s1051_s26  ;;  %s1055_s23 = sshll.u32 %s1201_s13, 4  ;;  %s1056_s23 = int_to_ptr.vmem [resolvable:$false] %s1055_s23 }
  0x62   : > { %vm1401_vm6 = vcmp.ne.s32.totalorder %v515_v28, 0  ;;  %v508_v40 = vadd.f32 %v507_v39, %v506_v38  ;;  %s1057_s11 = scalar_lea.vmem %s1056_s23, 256  ;;  %p1058_p4 = scmp.lt.s32.totalorder %s579_s9, %s1056_s23 }
  0x63   : > { %v517_v31 = vsel %vm1401_vm6, %v513_v30, 0.0  ;;  %p1053_p1 = pnand %p1052_p0, %p1299_p9  ;;  %p1059_p5 = scmp.lt.s32.totalorder %s1057_s11, %s1051_s26 }
  0x64   : > { %483 = vmax.xlane.f32.xlu0 %v482_v14  ;;  %518 = vst.msk [vmem:[%s438_s22] sm:$0xff] %vm478_vm2, %v517_v31 }
  0x65   : > { %p1054_p3 = pneg %p1053_p1  ;;  %p1060_p6 = por %p1059_p5, %p1058_p4 }
  0x67   : > { %p1061_p7 = pnand %p1060_p6, %p1054_p3 }
  0xe9   : > { %v481_v15 = vpop.xlane.xlu0 %480 }
  0xed   : > { %v484_v16 = vpop.xlane.xlu0 %483 }
  0xee   : > { %v485_v17 = vmax.f32 %v481_v15, %v484_v16 }
  0xf0   : > { %v486_v18 = vsub.f32 %v476_v11, %v485_v17  ;;  %v487_v19 = vsub.f32 %v477_v13, %v485_v17  ;;  %v509_v42 = vsub.f32 %v508_v40, %v485_v17 }
  0xf2   : > { %v488_v20 = vmul.f32 1.442695, %v486_v18  ;;  %v490_v21 = vmul.f32 1.442695, %v487_v19 }
  0xf4   : > { %957 = vpow2.f32 %v488_v20 }
  0xf5   : > { %959 = vpow2.f32 %v490_v21 }
 0x101   : > { %v958_v22 = vpop.eup %957 }
 0x102   : > { %v492_v23 = vsel %vm478_vm2, %v958_v22, 0.0  ;;  %v960_v24 = vpop.eup %959 }
 0x103   : > { %493 = vadd.xlane.f32.xlu1 %v492_v23  ;;  %v495_v25 = vsel %vm478_vm2, %v960_v24, 0.0 }
 0x107   : > { %496 = vadd.xlane.f32.xlu1 %v495_v25 }
 0x18c   : > { %v494_v32 = vpop.xlane.xlu1 %493 }
 0x190   : > { %v497_v33 = vpop.xlane.xlu1 %496 }
 0x191   : > { %v498_v35 = vadd.f32 %v497_v33, %v494_v32 }
 0x193   : > { %961 = vlog2.f32 %v498_v35 }
 0x1a0   : > { %v962_v41 = vpop.eup %961 }
 0x1a1   : > { %v500_v43 = vmul.f32 0.6931472, %v962_v41 }
 0x1a3   : > { %v510_v44 = vsub.f32 %v509_v42, %v500_v43 }
 0x1a5   : > { %v532_v45 = vsel %vm1401_vm6, %v510_v44, -3.4028235e+38  ;;  %v519_v46 = vmul.f32 %v517_v31, %v510_v44 }
 0x1a6   : > { %v534_v47 = vsel %vm478_vm2, %v532_v45, -inf  ;;  %533 = vst.msk [vmem:[%s424_s12] sm:$0xff] %vm478_vm2, %v532_v45 }
 0x1a7   : > { %535 = vmax.xlane.f32.xlu0 %v534_v47  ;;  %v520_v48 = vsub.f32 0.0, %v519_v46 }
 0x1a9   : > { %v521_v49 = vsel %vm478_vm2, %v520_v48, 0.0 }
 0x1ab   : > { %522 = vadd.xlane.f32.xlu0 %v521_v49 }
 0x230   : > { %v536_v50 = vpop.xlane.xlu0 %535 }
 0x231   : > { %v537_v51 = vsub.f32 %v532_v45, %v536_v50 }
 0x233   : > { %v538_v52 = vmul.f32 1.442695, %v537_v51 }
 0x234   : > { %v523_v53 = vpop.xlane.xlu0 %522 }
 0x235   : > { %963 = vpow2.f32 %v538_v52  ;;  %v524_v54 = vrot.slane %v523_v53, 4 }
 0x237   : > { %v525_v55 = vadd.f32 %v524_v54, %v523_v53 }
 0x239   : > { %v526_v56 = vrot.slane %v525_v55, 2 }
 0x23b   : > { %v527_v57 = vadd.f32 %v526_v56, %v525_v55 }
 0x23d   : > { %v528_v58 = vrot.slane %v527_v57, 1 }
 0x23f   : > { %v529_v59 = vadd.f32 %v528_v58, %v527_v57 }
 0x241   : > { %531 = vst.msk [vmem:[%s459_s24] sm:$0x1] %vm530_vm9, %v529_v59 }
 0x242   : > { %v964_v60 = vpop.eup %963 }
 0x243   : > { %v540_v61 = vsel %vm478_vm2, %v964_v60, 0.0 }
 0x244   : > { %541 = vadd.xlane.f32.xlu1 %v540_v61 }
 0x245   : > { %1064 = shalt.err (!%p1061_p7)
}
 0x246   : > { %s1065_s27 = scalar_lea.hbm %s576_s29, 128  ;;  %s1069_s15 = scalar_lea.hbm %s1543_s4, 256 }
 0x247   : > { %p1066_p10 = scmp.ne.s32.totalorder %s576_s29, %s1065_s27  ;;  %p1070_p8 = scmp.lt.s32.totalorder %s576_s29, %s1543_s4 }
 0x248   : > { %p1071_p0 = scmp.lt.s32.totalorder %s1069_s15, %s1065_s27 }
 0x249   : > { %p1067_p13 = pnand %p1066_p10, %p1299_p9 }
 0x24a   : > { %p1072_p1 = por %p1071_p0, %p1070_p8 }
 0x24b   : > { %p1068_p2 = pneg %p1067_p13 }
 0x24d   : > { %p1073_p12 = pnand %p1072_p1, %p1068_p2 }
 0x24f   : > { %1076 = shalt.err (!%p1073_p12)
}
 0x250   : > { %876 = dma.vmem_to_hbm [thread:$0]  (%p1299_p9), %s579_s9, 128, %s576_s29, %s548_s20  }
 0x251   : > { %s431_s8 = scalar_lea.vmem [#allocation9], %s1399_s16  ;;  %s606_s24 = sshll.u32 %s438_s22, 4  ;;  %s1465_s24 = int_to_ptr.vmem [resolvable:$true] %s606_s24 }
 0x252   : > { %s592_s10 = sshll.u32 %s431_s8, 4  ;;  %s1453_s26 = scalar_lea.hbm %s1544_s5, %s1427_s19  ;;  %s1455_s10 = int_to_ptr.vmem [resolvable:$true] %s592_s10 }
 0x253   : > { %s1574_s20 = sld [smem:[#allocation24_spill]]  ;;  %s1470_s16 = scalar_lea.sflag [#allocation10], %s370_s6 }
 0x254   : > { %s1077_s22 = scalar_lea.vmem %s1455_s10, 128  ;;  %s1202_s23 = smov [#allocation9]  }
 0x255   : > { %p1078_p12 = scmp.ne.s32.totalorder %s1455_s10, %s1077_s22  ;;  %s1081_s11 = sshll.u32 %s1202_s23, 4  ;;  %s1082_s11 = int_to_ptr.vmem [resolvable:$false] %s1081_s11 }
 0x256   : > { %s1083_s27 = scalar_lea.vmem %s1082_s11, 256  ;;  %p1084_p5 = scmp.lt.s32.totalorder %s1455_s10, %s1082_s11 }
 0x257   : > { %p1079_p3 = pnand %p1078_p12, %p1299_p9  ;;  %p1085_p6 = scmp.lt.s32.totalorder %s1083_s27, %s1077_s22 }
 0x259   : > { %s1463_s13 = scalar_lea.hbm %s1574_s20, %s1427_s19  ;;  %p1080_p4 = pneg %p1079_p3 }
 0x25a   : > { %p1086_p7 = por %p1085_p6, %p1084_p5 }
 0x25c   : > { %p1087_p10 = pnand %p1086_p7, %p1080_p4 }
 0x2cd   : > { %v542_v62 = vpop.xlane.xlu1 %541 }
 0x2ce   : > { %965 = vrcp.f32 %v542_v62 }
 0x2db   : > { %v966_v63 = vpop.eup %965 }
 0x2dc   : > { %v544_v0 = vmul.f32 %v966_v63, %v964_v60 }
 0x2de   : > { %v545_v1 = vsel %vm1401_vm6, %v544_v0, 0.0 }
 0x2df   : > { %546 = vst.msk [vmem:[%s431_s8] sm:$0xff] %vm478_vm2, %v545_v1 }
 0x2e0   : > { %1090 = shalt.err (!%p1087_p10)
}
 0x2e1   : > { %s1091_s30 = scalar_lea.hbm %s1453_s26, 128  ;;  %s1095_s0 = scalar_lea.hbm %s1544_s5, 256 }
 0x2e2   : > { %p1092_p13 = scmp.ne.s32.totalorder %s1453_s26, %s1091_s30  ;;  %p1096_p0 = scmp.lt.s32.totalorder %s1453_s26, %s1544_s5 }
 0x2e3   : > { %p1097_p1 = scmp.lt.s32.totalorder %s1095_s0, %s1091_s30 }
 0x2e4   : > { %p1093_p2 = pnand %p1092_p13, %p1299_p9 }
 0x2e5   : > { %p1098_p12 = por %p1097_p1, %p1096_p0 }
 0x2e6   : > { %p1094_p8 = pneg %p1093_p2 }
 0x2e8   : > { %p1099_p3 = pnand %p1098_p12, %p1094_p8 }
 0x2ea   : > { %1102 = shalt.err (!%p1099_p3)
}
 0x2eb   : > { %877 = dma.vmem_to_hbm [thread:$0]  (%p1299_p9), %s1455_s10, 128, %s1453_s26, %s1470_s16  }
 0x2ec   : > { %s1103_s21 = scalar_lea.vmem %s1465_s24, 128  ;;  %s1203_s12 = smov [#allocation11]  }
 0x2ed   : > { %p1104_p4 = scmp.ne.s32.totalorder %s1465_s24, %s1103_s21  ;;  %s1107_s8 = sshll.u32 %s1203_s12, 4  ;;  %s1108_s8 = int_to_ptr.vmem [resolvable:$false] %s1107_s8 }
 0x2ee   : > { %s1109_s1 = scalar_lea.vmem %s1108_s8, 256  ;;  %p1110_p7 = scmp.lt.s32.totalorder %s1465_s24, %s1108_s8 }
 0x2ef   : > { %p1105_p5 = pnand %p1104_p4, %p1299_p9  ;;  %p1111_p10 = scmp.lt.s32.totalorder %s1109_s1, %s1103_s21 }
 0x2f1   : > { %p1106_p6 = pneg %p1105_p5  ;;  %p1112_p13 = por %p1111_p10, %p1110_p7 }
 0x2f3   : > { %p1113_p2 = pnand %p1112_p13, %p1106_p6 }
 0x2f5   : > { %1116 = shalt.err (!%p1113_p2)
}
 0x2f6   : > { %s1117_s17 = scalar_lea.hbm %s1463_s13, 128  ;;  %s1121_s29 = scalar_lea.hbm %s1574_s20, 256 }
 0x2f7   : > { %p1118_p8 = scmp.ne.s32.totalorder %s1463_s13, %s1117_s17  ;;  %p1122_p12 = scmp.lt.s32.totalorder %s1463_s13, %s1574_s20 }
 0x2f8   : > { %p1123_p3 = scmp.lt.s32.totalorder %s1121_s29, %s1117_s17 }
 0x2f9   : > { %p1119_p0 = pnand %p1118_p8, %p1299_p9 }
 0x2fa   : > { %p1124_p4 = por %p1123_p3, %p1122_p12 }
 0x2fb   : > { %p1120_p1 = pneg %p1119_p0 }
 0x2fd   : > { %p1125_p5 = pnand %p1124_p4, %p1120_p1 }
 0x2ff   : > { %1128 = shalt.err (!%p1125_p5)
}
 0x300   : > { %878 = dma.vmem_to_hbm [thread:$0]  (%p1299_p9), %s1465_s24, 128, %s1463_s13, %s1470_s16  }
 0x301 PF: > { %s1575_s23 = sld [smem:[#allocation16_spill]] }
 0x302   : > { %s1577_s27 = sld [smem:[#allocation18_spill]] }
 0x307   : > { %s621_s30 = sand.u32 1, %s1575_s23  }
 0x308   : > { %p1578_p6 = scmp.ge.s32.totalorder %s1577_s27, 2  ;;  %s622_s6 = scalar_lea.sflag [#allocation4], %s621_s30 }
 0x30a   : > { %p893_p7 = pnand %p1578_p6, %p1308_p11 }
 0x30c   : > { %p894_p10 = pneg %p893_p7 }
 0x30e   : > { %1162 = dma.done.wait (%p894_p10), %s622_s6, 128  }
 0x30f   : > { %1164 = vsyncadd (%p894_p10), %s622_s6, 4294967168  ;;  %s1579_s19 = sadd.s32 4294967294, %s1577_s27  }
 0x310   : > { %s630_s0 = sand.u32 1, %s1579_s19  }
 0x311   : > { %s631_s14 = scalar_lea.sflag [#allocation10], %s630_s0 }
 0x312   : > { %1166 = dma.done.wait (%p894_p10), %s631_s14, 256  }
 0x313   : > { %1168 = vsyncadd (%p894_p10), %s631_s14, 4294967040  ;;  %s30_s29 = sadd.s32 1, %s1577_s27   ;;  %s1580_s13 = sld [smem:[#allocation17_spill]] }
 0x314   : > { %p27_p9 = scmp.ge.s32.totalorder %s30_s29, 4   ;;  %s1581_s26 = sld [smem:[#allocation20_spill]] }
 0x315   : > { %s1582_s16 = sld [smem:[#allocation19_spill]]  ;;  %s1583_s24 = smov %s1175_s25 }
 0x316   : > { %s1585_s27 = smov %s1187_s28 }
 0x317   :  { %29 = sbr.rel (!%p27_p9) target bundleno = 14 (0xe), region = 152 }
 0x319   : > { %s1584_s25 = smov %s1580_s13 }
 0x31b   : > { %s1586_s28 = smov %s1582_s16 }
 0x31c   :  { %654 = vsyncpa [#allocation3], 1 }
 0x31d   :  { %656 = vsyncpa [#allocation3 + $0x1], 1 }
 0x31e   :  { %657 = vsyncpa [#allocation6], 1 }
 0x31f   :  { %659 = vsyncpa [#allocation6 + $0x1], 1 }
 0x320   :  { %660 = vsyncpa [#allocation4], 1 }
 0x321   :  { %662 = vsyncpa [#allocation4 + $0x1], 1 }
 0x322   :  { %663 = vsyncpa [#allocation10], 1 }
 0x323   :  { %665 = vsyncpa [#allocation10 + $0x1], 1 }

</bundles_post_ra>
